<compile_context>
chip_gen: v5e
topology: v5e:2x2
jax: 0.10.0
libtpu: 0.0.40
codegen_flags: <defaults>
</compile_context>

<pallas_src>
import functools

import jax
import jax.numpy as jnp
from jax.experimental import pallas as pl
from jax.experimental.pallas import tpu as pltpu


def _round_up(n, m):
    return -(-n // m) * m


def _vmem_cap_bytes():
    """Half of the per-core VMEM capacity (headroom for compiler scratch)."""
    try:
        cap = int(pltpu.get_tpu_info().vmem_capacity_bytes)
    except Exception:
        cap = 64 << 20  # conservative v7x per-TC default
    return max(cap // 2, 16 << 20)


def _mlp_kernel(x_ref, w1_ref, b1_ref, w2_ref, b2_ref, w3_ref, b3_ref, o_ref):
    """Fused Linear->ReLU->Linear->ReLU->Linear on one batch tile."""
    # In-kernel f32 -> bf16 cast of the activation tile (VPU, hides under MXU).
    x = x_ref[...].astype(w1_ref.dtype)
    # Layer 1: MXU matmul (bf16 operands, f32 accumulation) + bias + ReLU.
    h1 = jnp.dot(x, w1_ref[...], preferred_element_type=jnp.float32)
    h1 = jnp.maximum(h1 + b1_ref[...], 0.0).astype(w2_ref.dtype)
    # Layer 2: Linear + ReLU (K=512, N=256 -> full-width MXU, the dominant FLOPs).
    h2 = jnp.dot(h1, w2_ref[...], preferred_element_type=jnp.float32)
    h2 = jnp.maximum(h2 + b2_ref[...], 0.0).astype(w3_ref.dtype)
    # Layer 3: Linear (no activation).  Output last dim == full array dim, so the
    # (narrow) store is legal without padding; no wrapper-side slice needed.
    out = jnp.dot(h2, w3_ref[...], preferred_element_type=jnp.float32)
    o_ref[...] = (out + b3_ref[...]).astype(o_ref.dtype)


def prepare_gvf_params(w1, b1, w2, b2, w3, b3, compute_dtype=jnp.bfloat16):
    """One-time parameter prep: bf16 MXU weights ([in, out]), f32 row-vector biases.

    Call this once (outside any jit/training step) and reuse the result so the
    per-call forward does no weight casting.
    """
    def _w(w):
        return jnp.asarray(w, compute_dtype)

    def _b(b):
        return jnp.asarray(b, jnp.float32).reshape(1, -1)

    return _w(w1), _b(b1), _w(w2), _b(b2), _w(w3), _b(b3)


@functools.partial(jax.jit, static_argnames=("block_b",))
def gvf_model_forward(x, w1, b1, w2, b2, w3, b3, *, block_b=1024):
    """x: [B, input_len] float32 -> [B, output_len] float32.

    Weights/biases must come from prepare_gvf_params (bf16 weights, f32 biases).
    block_b is the main tuning knob for large batches (sweep ~512..1024 on v5e,
    ~1024..2048 on v6e/v7x; keep it a multiple of 8).
    """
    B, in_len = x.shape
    h1_dim = w1.shape[1]
    h2_dim = w2.shape[1]
    out_len = w3.shape[1]
    w_itemsize = jnp.dtype(w1.dtype).itemsize

    # ---- Batch tile: big to fill the MXU, clamped (a) to the batch and (b) so the
    # grid has >= 2 steps when possible -> the "parallel" axis shards across both
    # TensorCores on v7x.  Always a multiple of 8 sublanes.
    bb = min(block_b, _round_up(pl.cdiv(B, 2), 8), _round_up(B, 8))
    bb = max(8, _round_up(bb, 8))
    grid = (pl.cdiv(B, bb),)

    # ---- VMEM budget: double-buffered x/out tiles + (revisited, but still
    # double-buffered by default) weights/biases + f32 intermediates; headroom;
    # capped at half the per-core VMEM capacity of the current generation.
    weight_bytes = (in_len * h1_dim + h1_dim * h2_dim + h2_dim * out_len) * w_itemsize
    bias_bytes = (h1_dim + h2_dim + out_len) * 4
    act_bytes = bb * (in_len * 4 + out_len * 4)          # x tile (f32) + out tile (f32)
    interm_bytes = bb * (in_len + h1_dim + h2_dim) * 4   # in-kernel temporaries
    est = 2 * (act_bytes + weight_bytes + bias_bytes) + interm_bytes
    vmem_limit = min(max(est + (8 << 20), 16 << 20), _vmem_cap_bytes())

    # ---- Advisory cost estimate for XLA scheduling around the custom call.
    flops = 2 * B * (in_len * h1_dim + h1_dim * h2_dim + h2_dim * out_len)
    bytes_accessed = (B * in_len * 4 + weight_bytes + bias_bytes + B * out_len * 4)
    cost = pl.CostEstimate(flops=flops, transcendentals=0,
                           bytes_accessed=bytes_accessed)

    # NOTE: the six weight/bias blocks use constant index_maps, so Pallas keeps
    # revisiting the same VMEM block across grid steps (no per-step re-DMA).
    return pl.pallas_call(
        _mlp_kernel,
        out_shape=jax.ShapeDtypeStruct((B, out_len), jnp.float32),
        grid=grid,
        in_specs=[
            pl.BlockSpec((bb, in_len), lambda i: (i, 0)),        # x tile (f32)
            pl.BlockSpec((in_len, h1_dim), lambda i: (0, 0)),    # w1 (bf16)
            pl.BlockSpec((1, h1_dim), lambda i: (0, 0)),         # b1 (f32)
            pl.BlockSpec((h1_dim, h2_dim), lambda i: (0, 0)),    # w2 (bf16)
            pl.BlockSpec((1, h2_dim), lambda i: (0, 0)),         # b2 (f32)
            pl.BlockSpec((h2_dim, out_len), lambda i: (0, 0)),   # w3 (bf16)
            pl.BlockSpec((1, out_len), lambda i: (0, 0)),        # b3 (f32)
        ],
        out_specs=pl.BlockSpec((bb, out_len), lambda i: (i, 0)),
        compiler_params=pltpu.CompilerParams(
            dimension_semantics=("parallel",),
            vmem_limit_bytes=int(vmem_limit),
        ),
        cost_estimate=cost,
    )(x, w1, b1, w2, b2, w3, b3)


def init_linear_params(key, fan_in, fan_out):
    """Deterministic PyTorch-style Linear init: U(-1/sqrt(fan_in), 1/sqrt(fan_in))."""
    kw, kb = jax.random.split(key)
    bound = 1.0 / jnp.sqrt(fan_in)
    w = jax.random.uniform(kw, (fan_in, fan_out), jnp.float32, -bound, bound)
    b = jax.random.uniform(kb, (fan_out,), jnp.float32, -bound, bound)
    return w, b


if __name__ == "__main__":
    # Small, module-consistent shapes.
    batch = 8
    input_len = 32
    output_len = 16

    key = jax.random.PRNGKey(0)
    kx, k1, k2, k3 = jax.random.split(key, 4)

    x = jax.random.normal(kx, (batch, input_len), jnp.float32)
    w1, b1 = init_linear_params(k1, input_len, 512)
    w2, b2 = init_linear_params(k2, 512, 256)
    w3, b3 = init_linear_params(k3, 256, output_len)

    # One-time param prep (bf16 MXU weights, f32 biases).
    params = prepare_gvf_params(w1, b1, w2, b2, w3, b3)

    y = gvf_model_forward(x, *params)
    y = jax.block_until_ready(y)

    # Pure-JAX f32 reference; bf16 MXU operands -> looser tolerance.
    h = jnp.maximum(x @ w1 + b1[None, :], 0.0)
    h = jnp.maximum(h @ w2 + b2[None, :], 0.0)
    y_ref = h @ w3 + b3[None, :]
    assert y.shape == (batch, output_len)
    assert jnp.allclose(y, y_ref, atol=5e-2, rtol=5e-2), float(
        jnp.max(jnp.abs(y - y_ref)))

    print("KERNEL_OK")
</pallas_src>

<mosaic_0001>
module attributes {stable_mosaic.version = 11 : i64} {
  func.func @_mlp_kernel(%arg0: i32, %arg1: memref<8x32xf32, #tpu.memory_space<vmem>>, %arg2: memref<32x512xbf16, #tpu.memory_space<vmem>>, %arg3: memref<1x512xf32, #tpu.memory_space<vmem>>, %arg4: memref<512x256xbf16, #tpu.memory_space<vmem>>, %arg5: memref<1x256xf32, #tpu.memory_space<vmem>>, %arg6: memref<256x16xbf16, #tpu.memory_space<vmem>>, %arg7: memref<1x16xf32, #tpu.memory_space<vmem>>, %arg8: memref<8x16xf32, #tpu.memory_space<vmem>>) attributes {dimension_semantics = [#tpu.dimension_semantics<parallel>], iteration_bounds = array<i64: 1>, scalar_prefetch = 0 : i64, scratch_operands = 0 : i64, tpu.core_type = #tpu.core_type<tc>, window_params = [{transform_indices = @transform_0, window_bounds = array<i64: 8, 32>}, {pipeline_mode = #tpu.pipeline_mode<synchronous>, transform_indices = @transform_1, window_bounds = array<i64: 32, 512>}, {pipeline_mode = #tpu.pipeline_mode<synchronous>, transform_indices = @transform_2, window_bounds = array<i64: 1, 512>}, {pipeline_mode = #tpu.pipeline_mode<synchronous>, transform_indices = @transform_3, window_bounds = array<i64: 512, 256>}, {pipeline_mode = #tpu.pipeline_mode<synchronous>, transform_indices = @transform_4, window_bounds = array<i64: 1, 256>}, {pipeline_mode = #tpu.pipeline_mode<synchronous>, transform_indices = @transform_5, window_bounds = array<i64: 256, 16>}, {pipeline_mode = #tpu.pipeline_mode<synchronous>, transform_indices = @transform_6, window_bounds = array<i64: 1, 16>}, {transform_indices = @transform_7, window_bounds = array<i64: 8, 16>}]} {
    %c0 = arith.constant 0 : index
    %c0_0 = arith.constant 0 : index
    %0 = vector.load %arg1[%c0, %c0_0] : memref<8x32xf32, #tpu.memory_space<vmem>>, vector<8x32xf32>
    %1 = arith.truncf %0 : vector<8x32xf32> to vector<8x32xbf16>
    %c0_1 = arith.constant 0 : index
    %c0_2 = arith.constant 0 : index
    %2 = vector.load %arg2[%c0_1, %c0_2] : memref<32x512xbf16, #tpu.memory_space<vmem>>, vector<32x512xbf16>
    %cst = arith.constant dense<0.000000e+00> : vector<8x512xf32>
    %3 = tpu.matmul %1, %2, %cst {dimension_numbers = #tpu.dot_dimension_numbers<[1], [0], [0], [1], [0, 0, 1, 1], [], []>} : vector<8x32xbf16>, vector<32x512xbf16>, vector<8x512xf32> -> vector<8x512xf32>
    %c0_3 = arith.constant 0 : index
    %c0_4 = arith.constant 0 : index
    %4 = vector.load %arg3[%c0_3, %c0_4] : memref<1x512xf32, #tpu.memory_space<vmem>>, vector<1x512xf32>
    %5 = vector.broadcast %4 : vector<1x512xf32> to vector<8x512xf32>
    %6 = arith.addf %3, %5 : vector<8x512xf32>
    %cst_5 = arith.constant 0.000000e+00 : f32
    %7 = vector.broadcast %cst_5 : f32 to vector<8x512xf32>
    %8 = arith.maximumf %6, %7 : vector<8x512xf32>
    %9 = arith.truncf %8 : vector<8x512xf32> to vector<8x512xbf16>
    %c0_6 = arith.constant 0 : index
    %c0_7 = arith.constant 0 : index
    %10 = vector.load %arg4[%c0_6, %c0_7] : memref<512x256xbf16, #tpu.memory_space<vmem>>, vector<512x256xbf16>
    %cst_8 = arith.constant dense<0.000000e+00> : vector<8x256xf32>
    %11 = tpu.matmul %9, %10, %cst_8 {dimension_numbers = #tpu.dot_dimension_numbers<[1], [0], [0], [1], [0, 0, 1, 1], [], []>} : vector<8x512xbf16>, vector<512x256xbf16>, vector<8x256xf32> -> vector<8x256xf32>
    %c0_9 = arith.constant 0 : index
    %c0_10 = arith.constant 0 : index
    %12 = vector.load %arg5[%c0_9, %c0_10] : memref<1x256xf32, #tpu.memory_space<vmem>>, vector<1x256xf32>
    %13 = vector.broadcast %12 : vector<1x256xf32> to vector<8x256xf32>
    %14 = arith.addf %11, %13 : vector<8x256xf32>
    %cst_11 = arith.constant 0.000000e+00 : f32
    %15 = vector.broadcast %cst_11 : f32 to vector<8x256xf32>
    %16 = arith.maximumf %14, %15 : vector<8x256xf32>
    %17 = arith.truncf %16 : vector<8x256xf32> to vector<8x256xbf16>
    %c0_12 = arith.constant 0 : index
    %c0_13 = arith.constant 0 : index
    %18 = vector.load %arg6[%c0_12, %c0_13] : memref<256x16xbf16, #tpu.memory_space<vmem>>, vector<256x16xbf16>
    %cst_14 = arith.constant dense<0.000000e+00> : vector<8x16xf32>
    %19 = tpu.matmul %17, %18, %cst_14 {dimension_numbers = #tpu.dot_dimension_numbers<[1], [0], [0], [1], [0, 0, 1, 1], [], []>} : vector<8x256xbf16>, vector<256x16xbf16>, vector<8x16xf32> -> vector<8x16xf32>
    %c0_15 = arith.constant 0 : index
    %c0_16 = arith.constant 0 : index
    %20 = vector.load %arg7[%c0_15, %c0_16] : memref<1x16xf32, #tpu.memory_space<vmem>>, vector<1x16xf32>
    %21 = vector.broadcast %20 : vector<1x16xf32> to vector<8x16xf32>
    %22 = arith.addf %19, %21 : vector<8x16xf32>
    %c0_17 = arith.constant 0 : index
    %c0_18 = arith.constant 0 : index
    %23 = vector.load %arg8[%c0_17, %c0_18] : memref<8x16xf32, #tpu.memory_space<vmem>>, vector<8x16xf32>
    tpu.vector_store %arg8[%c0_17, %c0_18], %22 {strides = array<i32>} : memref<8x16xf32, #tpu.memory_space<vmem>>, vector<8x16xf32>,
    return
  }
  func.func @transform_0(%arg0: i32) -> (i32, i32) {
    %c0_i32 = arith.constant 0 : i32
    %c0_i32_0 = arith.constant 0 : i32
    return %arg0, %c0_i32 : i32, i32
  }
  func.func @transform_1(%arg0: i32) -> (i32, i32) {
    %c0_i32 = arith.constant 0 : i32
    %c0_i32_0 = arith.constant 0 : i32
    %c0_i32_1 = arith.constant 0 : i32
    return %c0_i32, %c0_i32_0 : i32, i32
  }
  func.func @transform_2(%arg0: i32) -> (i32, i32) {
    %c0_i32 = arith.constant 0 : i32
    %c0_i32_0 = arith.constant 0 : i32
    %c0_i32_1 = arith.constant 0 : i32
    return %c0_i32, %c0_i32_0 : i32, i32
  }
  func.func @transform_3(%arg0: i32) -> (i32, i32) {
    %c0_i32 = arith.constant 0 : i32
    %c0_i32_0 = arith.constant 0 : i32
    %c0_i32_1 = arith.constant 0 : i32
    return %c0_i32, %c0_i32_0 : i32, i32
  }
  func.func @transform_4(%arg0: i32) -> (i32, i32) {
    %c0_i32 = arith.constant 0 : i32
    %c0_i32_0 = arith.constant 0 : i32
    %c0_i32_1 = arith.constant 0 : i32
    return %c0_i32, %c0_i32_0 : i32, i32
  }
  func.func @transform_5(%arg0: i32) -> (i32, i32) {
    %c0_i32 = arith.constant 0 : i32
    %c0_i32_0 = arith.constant 0 : i32
    %c0_i32_1 = arith.constant 0 : i32
    return %c0_i32, %c0_i32_0 : i32, i32
  }
  func.func @transform_6(%arg0: i32) -> (i32, i32) {
    %c0_i32 = arith.constant 0 : i32
    %c0_i32_0 = arith.constant 0 : i32
    %c0_i32_1 = arith.constant 0 : i32
    return %c0_i32, %c0_i32_0 : i32, i32
  }
  func.func @transform_7(%arg0: i32) -> (i32, i32) {
    %c0_i32 = arith.constant 0 : i32
    %c0_i32_0 = arith.constant 0 : i32
    return %arg0, %c0_i32 : i32, i32
  }
}

</mosaic_0001>

<bundles_post_ra>
// kernel: gvf_model_forward.1
= control target key start
LH: loop header
LB: loop body
LE: loop exit
PB: predicated region body
PF: predicated region fallthrough
CT: control target
= control target key end

     0   :  { %12 = vsyncpa [#allocation3], 0  ;;  %s1512_s0 = inlined_call_operand.vmem [shape: f32[8,32], index: 0, kind: input, shape index: {}]   ;;  %s1513_s1 = inlined_call_operand.vmem [shape: bf16[32,512], index: 1, kind: input, shape index: {}]   ;;  %s1514_s2 = inlined_call_operand.vmem [shape: f32[1,512], index: 2, kind: input, shape index: {}]   ;;  %s1515_s3 = inlined_call_operand.hbm [shape: bf16[512,256], index: 3, kind: input, shape index: {}]   ;;  %s1516_s4 = inlined_call_operand.vmem [shape: f32[1,256], index: 4, kind: input, shape index: {}]   ;;  %s1517_s5 = inlined_call_operand.vmem [shape: bf16[256,16], index: 5, kind: input, shape index: {}]   ;;  %s1518_s6 = inlined_call_operand.vmem [shape: f32[1,16], index: 6, kind: input, shape index: {}]   ;;  %s1519_s7 = inlined_call_operand.hbm [shape: f32[8,16], index: 7, kind: output, shape index: {}]  }
   0x1   :  { %13 = vsyncpa [#allocation4], 0  ;;  %s24_s26 = sshll.u32 %s1515_s3, 4  ;;  %s1344_s27 = smov [#allocation2]   ;;  %s25_s26 = int_to_ptr.hbm [resolvable:$true] %s24_s26 }
   0x2   :  { %s26_s28 = sshll.u32 %s1344_s27, 4  ;;  %s1345_s29 = smov 128   ;;  %s27_s28 = int_to_ptr.vmem [resolvable:$true] %s26_s28 }
   0x3   :  { %s1346_s30 = smov 8  }
   0x4   :  { %32 = dma.hbm_to_vmem [thread:$0]  %s25_s26, 8192, %s27_s28, [#allocation3], %s1345_s29, %s1345_s29, %s1346_s30  }
   0x5   :  { %1340 = dma.done.wait [#allocation3], 8192  }
   0x6   :  { %1341 = vsyncadd [#allocation3], 4294959104  ;;  %v861_v0 = vld [vmem:[%s1513_s1 + $0x20] sm:$0xf]  ;;  %v1205_v1 = vld [vmem:[%s1513_s1 + $0x2c] sm:$0xf0] }
   0x7   :  { %v1203_v2 = vld [vmem:[%s1513_s1 + $0x24] sm:$0xf]  ;;  %v862_v3 = vor.u32 %v1205_v1, %v861_v0  ;;  %v863_v4 = vld [vmem:[%s1513_s1 + $0x30] sm:$0xf0]  ;;  %v845_v5 = vld [vmem:[%s1513_s1] sm:$0xf] }
   0x8   :  { %v1201_v6 = vld [vmem:[%s1513_s1 + $0xc] sm:$0xf0]  ;;  %v866_v7 = vor.u32 %v1203_v2, %v863_v4  ;;  %v1199_v8 = vld [vmem:[%s1513_s1 + $0x4] sm:$0xf]  ;;  %v847_v9 = vld [vmem:[%s1513_s1 + $0x10] sm:$0xf0] }
   0x9   :  { %v44_v10 = vld [vmem:[%s1512_s0] sm:$0xff]  ;;  %vm104_vm0 = vcmask 261120   ;;  %114 = vmatpush.bf16.msra.mxu2 %v862_v3  ;;  %v846_v11 = vor.u32 %v1201_v6, %v845_v5  ;;  %v869_v12 = vld [vmem:[%s1513_s1 + $0x28] sm:$0xf]  ;;  %v1206_v13 = vld [vmem:[%s1513_s1 + $0x34] sm:$0xf0]  ;;  %v850_v15 = vor.u32 %v1199_v8, %v847_v9 }
   0xa   :  { %v1204_v14 = vld [vmem:[%s1513_s1 + $0x2c] sm:$0xf]  ;;  %127 = vmatpush.bf16.msra.mxu3 %v866_v7  ;;  %v870_v16 = vor.u32 %v1206_v13, %v869_v12  ;;  %v871_v17 = vld [vmem:[%s1513_s1 + $0x38] sm:$0xf0]  ;;  %v853_v18 = vld [vmem:[%s1513_s1 + $0x8] sm:$0xf]  ;;  %v1442_v24 = vpack.c.bf16 %v44_v10, %v44_v10 }
   0xb   :  { %v1202_v19 = vld [vmem:[%s1513_s1 + $0x14] sm:$0xf0]  ;;  %v874_v20 = vor.u32 %v1204_v14, %v871_v17  ;;  %v1200_v21 = vld [vmem:[%s1513_s1 + $0xc] sm:$0xf]  ;;  %v855_v22 = vld [vmem:[%s1513_s1 + $0x18] sm:$0xf0] }
   0xc   :  { %v937_v23 = vld [vmem:[#allocation2 + $0x70] sm:$0xf]  ;;  %v1222_v25 = vld [vmem:[#allocation2 + $0x74] sm:$0xf0]  ;;  %v929_v30 = vld [vmem:[#allocation2 + $0x60] sm:$0xf]  ;;  %v854_v33 = vor.u32 %v1202_v19, %v853_v18  ;;  %v858_v35 = vor.u32 %v1200_v21, %v855_v22 }
   0xd   :  { %v1001_v26 = vld [vmem:[#allocation2 + $0xf0] sm:$0xf]  ;;  %v1238_v27 = vld [vmem:[#allocation2 + $0xf4] sm:$0xf0]  ;;  %115 = vmatpush.bf16.msra.mxu2 %v846_v11  ;;  %v938_v28 = vor.u32 %v1222_v25, %v937_v23  ;;  %v1220_v31 = vld [vmem:[#allocation2 + $0x64] sm:$0xf0] }
   0xe   :  { %v1002_v29 = vor.u32 %v1238_v27, %v1001_v26  ;;  %v993_v32 = vld [vmem:[#allocation2 + $0xe0] sm:$0xf]  ;;  %128 = vmatpush.bf16.msra.mxu3 %v850_v15  ;;  %v1236_v34 = vld [vmem:[#allocation2 + $0xe4] sm:$0xf0]  ;;  %v930_v36 = vor.u32 %v1220_v31, %v929_v30  ;;  %v921_v38 = vld [vmem:[#allocation2 + $0x50] sm:$0xf] }
   0xf   :  { %558 = vmatpush.bf16.msra.mxu0 %v938_v28  ;;  %v994_v37 = vor.u32 %v1236_v34, %v993_v32  ;;  %v1218_v39 = vld [vmem:[#allocation2 + $0x54] sm:$0xf0]  ;;  %v985_v40 = vld [vmem:[#allocation2 + $0xd0] sm:$0xf]  ;;  %v913_v45 = vld [vmem:[#allocation2 + $0x40] sm:$0xf] }
  0x10   :  { %875 = vmatmul.msk.bf16.vlgmr.msra.gmra.mxu2 %vm104_vm0, %v1442_v24  ;;  %571 = vmatpush.bf16.msra.mxu1 %v1002_v29  ;;  %v1234_v41 = vld [vmem:[#allocation2 + $0xd4] sm:$0xf0]  ;;  %v1065_v42 = vld [vmem:[#allocation2 + $0x170] sm:$0xf]  ;;  %v922_v44 = vor.u32 %v1218_v39, %v921_v38  ;;  %v1216_v50 = vld [vmem:[#allocation2 + $0x44] sm:$0xf0] }
  0x11   :  { %140 = vmatpush.bf16.msrb.mxu2 %v870_v16  ;;  %876 = vmatmul.msk.bf16.vlgmr.msra.gmra.mxu3 %vm104_vm0, %v1442_v24  ;;  %v1254_v43 = vld [vmem:[#allocation2 + $0x174] sm:$0xf0]  ;;  %v1129_v47 = vld [vmem:[#allocation2 + $0x1f0] sm:$0xf]  ;;  %v986_v49 = vor.u32 %v1234_v41, %v985_v40  ;;  %v977_v51 = vld [vmem:[#allocation2 + $0xc0] sm:$0xf]  ;;  %v914_v59 = vor.u32 %v1216_v50, %v913_v45 }
  0x12   :  { %153 = vmatpush.bf16.msrb.mxu3 %v874_v20  ;;  %v1066_v46 = vor.u32 %v1254_v43, %v1065_v42  ;;  %v1270_v48 = vld [vmem:[#allocation2 + $0x1f4] sm:$0xf0]  ;;  %v1232_v52 = vld [vmem:[#allocation2 + $0xc4] sm:$0xf0]  ;;  %v1057_v54 = vld [vmem:[#allocation2 + $0x160] sm:$0xf] }
  0x13   :  { %559 = vmatpush.bf16.msra.mxu0 %v930_v36  ;;  %v1130_v53 = vor.u32 %v1270_v48, %v1129_v47  ;;  %v1252_v55 = vld [vmem:[#allocation2 + $0x164] sm:$0xf0]  ;;  %v1121_v56 = vld [vmem:[#allocation2 + $0x1e0] sm:$0xf]  ;;  %v905_v60 = vld [vmem:[#allocation2 + $0x30] sm:$0xf]  ;;  %v978_v0 = vor.u32 %v1232_v52, %v977_v51 }
  0x14   :  { %572 = vmatpush.bf16.msra.mxu1 %v994_v37  ;;  %v1058_v57 = vor.u32 %v1252_v55, %v1057_v54  ;;  %v1268_v58 = vld [vmem:[#allocation2 + $0x1e4] sm:$0xf0]  ;;  %v1214_v61 = vld [vmem:[#allocation2 + $0x34] sm:$0xf0]  ;;  %v1049_v63 = vld [vmem:[#allocation2 + $0x150] sm:$0xf] }
  0x15   :  { %141 = vmatpush.bf16.msrb.mxu2 %v854_v33  ;;  %v1122_v62 = vor.u32 %v1268_v58, %v1121_v56  ;;  %v1250_v1 = vld [vmem:[#allocation2 + $0x154] sm:$0xf0]  ;;  %v1113_v2 = vld [vmem:[#allocation2 + $0x1d0] sm:$0xf]  ;;  %v1041_v8 = vld [vmem:[#allocation2 + $0x140] sm:$0xf]  ;;  %v906_v10 = vor.u32 %v1214_v61, %v905_v60 }
  0x16   :  { %154 = vmatpush.bf16.msrb.mxu3 %v858_v35  ;;  %v1266_v3 = vld [vmem:[#allocation2 + $0x1d4] sm:$0xf0]  ;;  %v969_v4 = vld [vmem:[#allocation2 + $0xb0] sm:$0xf]  ;;  %v1050_v6 = vor.u32 %v1250_v1, %v1049_v63  ;;  %v1248_v9 = vld [vmem:[#allocation2 + $0x144] sm:$0xf0] }
  0x17   :  { %560 = vmatpush.bf16.msra.mxu0 %v922_v44  ;;  %v1230_v5 = vld [vmem:[#allocation2 + $0xb4] sm:$0xf0]  ;;  %v1114_v7 = vor.u32 %v1266_v3, %v1113_v2  ;;  %v1105_v11 = vld [vmem:[#allocation2 + $0x1c0] sm:$0xf]  ;;  %v1264_v12 = vld [vmem:[#allocation2 + $0x1c4] sm:$0xf0]  ;;  %v1042_v18 = vor.u32 %v1248_v9, %v1041_v8 }
  0x18   :  { %573 = vmatpush.bf16.msra.mxu1 %v986_v49  ;;  %v970_v13 = vor.u32 %v1230_v5, %v969_v4  ;;  %v897_v14 = vld [vmem:[#allocation2 + $0x20] sm:$0xf]  ;;  %v1212_v15 = vld [vmem:[#allocation2 + $0x24] sm:$0xf0]  ;;  %v1106_v19 = vor.u32 %v1264_v12, %v1105_v11  ;;  %v1033_v20 = vld [vmem:[#allocation2 + $0x130] sm:$0xf] }
  0x19   :  { %584 = vmatpush.bf16.msra.mxu2 %v1066_v46  ;;  %v961_v16 = vld [vmem:[#allocation2 + $0xa0] sm:$0xf]  ;;  %v1228_v17 = vld [vmem:[#allocation2 + $0xa4] sm:$0xf0]  ;;  %v1246_v21 = vld [vmem:[#allocation2 + $0x134] sm:$0xf0]  ;;  %v898_v22 = vor.u32 %v1212_v15, %v897_v14 }
  0x1a   :  { %597 = vmatpush.bf16.msra.mxu3 %v1130_v53  ;;  %v1097_v23 = vld [vmem:[#allocation2 + $0x1b0] sm:$0xf]  ;;  %v1262_v25 = vld [vmem:[#allocation2 + $0x1b4] sm:$0xf0]  ;;  %v962_v26 = vor.u32 %v1228_v17, %v961_v16  ;;  %v1034_v31 = vor.u32 %v1246_v21, %v1033_v20  ;;  %v1025_v33 = vld [vmem:[#allocation2 + $0x120] sm:$0xf] }
  0x1b   :  { %561 = vmatpush.bf16.msra.mxu0 %v914_v59  ;;  %v889_v27 = vld [vmem:[#allocation2 + $0x10] sm:$0xf]  ;;  %v1210_v28 = vld [vmem:[#allocation2 + $0x14] sm:$0xf0]  ;;  %v1098_v32 = vor.u32 %v1262_v25, %v1097_v23  ;;  %v1244_v34 = vld [vmem:[#allocation2 + $0x124] sm:$0xf0] }
  0x1c   :  { %574 = vmatpush.bf16.msra.mxu1 %v978_v0  ;;  %v953_v29 = vld [vmem:[#allocation2 + $0x90] sm:$0xf]  ;;  %v1226_v30 = vld [vmem:[#allocation2 + $0x94] sm:$0xf0]  ;;  %v890_v35 = vor.u32 %v1210_v28, %v889_v27  ;;  %v1089_v36 = vld [vmem:[#allocation2 + $0x1a0] sm:$0xf]  ;;  %v1026_v44 = vor.u32 %v1244_v34, %v1025_v33 }
  0x1d   :  { %585 = vmatpush.bf16.msra.mxu2 %v1058_v57  ;;  %v1260_v37 = vld [vmem:[#allocation2 + $0x1a4] sm:$0xf0]  ;;  %v954_v38 = vor.u32 %v1226_v30, %v953_v29  ;;  %v881_v39 = vld [vmem:[#allocation2] sm:$0xf]  ;;  %v1221_v43 = vld [vmem:[#allocation2 + $0x74] sm:$0xf] }
  0x1e   :  { %598 = vmatpush.bf16.msra.mxu3 %v1122_v62  ;;  %v1208_v40 = vld [vmem:[#allocation2 + $0x4] sm:$0xf0]  ;;  %v945_v41 = vld [vmem:[#allocation2 + $0x80] sm:$0xf]  ;;  %v1237_v45 = vld [vmem:[#allocation2 + $0xf4] sm:$0xf]  ;;  %v1090_v47 = vor.u32 %v1260_v37, %v1089_v36 }
  0x1f   :  { %562 = vmatpush.bf16.msra.mxu0 %v906_v10  ;;  %v1224_v42 = vld [vmem:[#allocation2 + $0x84] sm:$0xf0]  ;;  %v1003_v46 = vld [vmem:[#allocation2 + $0xf8] sm:$0xf0]  ;;  %v882_v48 = vor.u32 %v1208_v40, %v881_v39  ;;  %v1219_v52 = vld [vmem:[#allocation2 + $0x64] sm:$0xf] }
  0x20   :  { %877 = vmatmul.msk.bf16.vlgmr.msrb.gmra.mxu2 %vm104_vm0, %v1442_v24  ;;  %575 = vmatpush.bf16.msra.mxu1 %v970_v13  ;;  %v946_v49 = vor.u32 %v1224_v42, %v945_v41  ;;  %v1006_v51 = vor.u32 %v1237_v45, %v1003_v46  ;;  %v931_v53 = vld [vmem:[#allocation2 + $0x68] sm:$0xf0]  ;;  %v1235_v54 = vld [vmem:[#allocation2 + $0xe4] sm:$0xf]  ;;  %v1217_v58 = vld [vmem:[#allocation2 + $0x54] sm:$0xf] }
  0x21   :  { %586 = vmatpush.bf16.msra.mxu2 %v1050_v6  ;;  %878 = vmatmul.msk.bf16.vlgmr.msrb.gmra.mxu3 %vm104_vm0, %v1442_v24  ;;  %v939_v24 = vld [vmem:[#allocation2 + $0x78] sm:$0xf0]  ;;  %v995_v55 = vld [vmem:[#allocation2 + $0xe8] sm:$0xf0]  ;;  %v934_v56 = vor.u32 %v1219_v52, %v931_v53  ;;  %v1233_v60 = vld [vmem:[#allocation2 + $0xd4] sm:$0xf] }
  0x22   :  { %599 = vmatpush.bf16.msra.mxu3 %v1114_v7  ;;  %v942_v50 = vor.u32 %v1221_v43, %v939_v24  ;;  %v998_v57 = vor.u32 %v1235_v54, %v995_v55  ;;  %v923_v59 = vld [vmem:[#allocation2 + $0x58] sm:$0xf0]  ;;  %v1017_v0 = vld [vmem:[#allocation2 + $0x110] sm:$0xf]  ;;  %v1242_v1 = vld [vmem:[#allocation2 + $0x114] sm:$0xf0] }
  0x23   :  { %563 = vmatpush.bf16.msra.mxu0 %v898_v22  ;;  %v926_v61 = vor.u32 %v1217_v58, %v923_v59  ;;  %v987_v62 = vld [vmem:[#allocation2 + $0xd8] sm:$0xf0]  ;;  %v1081_v2 = vld [vmem:[#allocation2 + $0x190] sm:$0xf]  ;;  %v1018_v3 = vor.u32 %v1242_v1, %v1017_v0  ;;  %v1258_v4 = vld [vmem:[#allocation2 + $0x194] sm:$0xf0] }
  0x24   :  { %576 = vmatpush.bf16.msra.mxu1 %v962_v26  ;;  %v990_v63 = vor.u32 %v1233_v60, %v987_v62  ;;  %v1215_v5 = vld [vmem:[#allocation2 + $0x44] sm:$0xf]  ;;  %v915_v6 = vld [vmem:[#allocation2 + $0x48] sm:$0xf0]  ;;  %v1082_v7 = vor.u32 %v1258_v4, %v1081_v2  ;;  %v1009_v12 = vld [vmem:[#allocation2 + $0x100] sm:$0xf] }
  0x25   :  { %587 = vmatpush.bf16.msra.mxu2 %v1042_v18  ;;  %v918_v8 = vor.u32 %v1215_v5, %v915_v6  ;;  %v1231_v9 = vld [vmem:[#allocation2 + $0xc4] sm:$0xf]  ;;  %v979_v10 = vld [vmem:[#allocation2 + $0xc8] sm:$0xf0]  ;;  %v1240_v13 = vld [vmem:[#allocation2 + $0x104] sm:$0xf0] }
  0x26   :  { %600 = vmatpush.bf16.msra.mxu3 %v1106_v19  ;;  %v982_v11 = vor.u32 %v1231_v9, %v979_v10  ;;  %v1073_v14 = vld [vmem:[#allocation2 + $0x180] sm:$0xf]  ;;  %v1010_v15 = vor.u32 %v1240_v13, %v1009_v12  ;;  %v1256_v16 = vld [vmem:[#allocation2 + $0x184] sm:$0xf0]  ;;  %v1213_v17 = vld [vmem:[#allocation2 + $0x34] sm:$0xf] }
  0x27   :  { %564 = vmatpush.bf16.msra.mxu0 %v890_v35  ;;  %v907_v18 = vld [vmem:[#allocation2 + $0x38] sm:$0xf0]  ;;  %v1074_v19 = vor.u32 %v1256_v16, %v1073_v14  ;;  %v1229_v21 = vld [vmem:[#allocation2 + $0xb4] sm:$0xf]  ;;  %v1227_v33 = vld [vmem:[#allocation2 + $0xa4] sm:$0xf] }
  0x28   :  { %577 = vmatpush.bf16.msra.mxu1 %v954_v38  ;;  %v910_v20 = vor.u32 %v1213_v17, %v907_v18  ;;  %v971_v22 = vld [vmem:[#allocation2 + $0xb8] sm:$0xf0]  ;;  %v1253_v23 = vld [vmem:[#allocation2 + $0x174] sm:$0xf]  ;;  %v963_v35 = vld [vmem:[#allocation2 + $0xa8] sm:$0xf0] }
  0x29   :  { %588 = vmatpush.bf16.msra.mxu2 %v1034_v31  ;;  %v974_v25 = vor.u32 %v1229_v21, %v971_v22  ;;  %v1067_v26 = vld [vmem:[#allocation2 + $0x178] sm:$0xf0]  ;;  %v1269_v27 = vld [vmem:[#allocation2 + $0x1f4] sm:$0xf]  ;;  %v1211_v31 = vld [vmem:[#allocation2 + $0x24] sm:$0xf]  ;;  %v966_v38 = vor.u32 %v1227_v33, %v963_v35 }
  0x2a   :  { %601 = vmatpush.bf16.msra.mxu3 %v1098_v32  ;;  %v1131_v28 = vld [vmem:[#allocation2 + $0x1f8] sm:$0xf0]  ;;  %v1070_v29 = vor.u32 %v1253_v23, %v1067_v26  ;;  %v899_v32 = vld [vmem:[#allocation2 + $0x28] sm:$0xf0]  ;;  %v1251_v36 = vld [vmem:[#allocation2 + $0x164] sm:$0xf] }
  0x2b   :  { %565 = vmatpush.bf16.msra.mxu0 %v882_v48  ;;  %v1134_v30 = vor.u32 %v1269_v27, %v1131_v28  ;;  %v902_v34 = vor.u32 %v1211_v31, %v899_v32  ;;  %v1059_v37 = vld [vmem:[#allocation2 + $0x168] sm:$0xf0]  ;;  %v1267_v40 = vld [vmem:[#allocation2 + $0x1e4] sm:$0xf]  ;;  %v1209_v43 = vld [vmem:[#allocation2 + $0x14] sm:$0xf] }
  0x2c   :  { %578 = vmatpush.bf16.msra.mxu1 %v946_v49  ;;  %v1062_v39 = vor.u32 %v1251_v36, %v1059_v37  ;;  %v1123_v41 = vld [vmem:[#allocation2 + $0x1e8] sm:$0xf0]  ;;  %v891_v24 = vld [vmem:[#allocation2 + $0x18] sm:$0xf0]  ;;  %v1207_v54 = vld [vmem:[#allocation2 + $0x4] sm:$0xf] }
  0x2d   :  { %589 = vmatpush.bf16.msra.mxu2 %v1026_v44  ;;  %v1126_v42 = vor.u32 %v1267_v40, %v1123_v41  ;;  %v1225_v44 = vld [vmem:[#allocation2 + $0x94] sm:$0xf]  ;;  %v894_v45 = vor.u32 %v1209_v43, %v891_v24  ;;  %v955_v46 = vld [vmem:[#allocation2 + $0x98] sm:$0xf0]  ;;  %v883_v55 = vld [vmem:[#allocation2 + $0x8] sm:$0xf0] }
  0x2e   :  { %602 = vmatpush.bf16.msra.mxu3 %v1090_v47  ;;  %v1249_v47 = vld [vmem:[#allocation2 + $0x154] sm:$0xf]  ;;  %v1051_v48 = vld [vmem:[#allocation2 + $0x158] sm:$0xf0]  ;;  %v958_v49 = vor.u32 %v1225_v44, %v955_v46  ;;  %v947_v58 = vld [vmem:[#allocation2 + $0x88] sm:$0xf0] }
  0x2f   :  { %610 = vmatpush.bf16.msrb.mxu0 %v942_v50  ;;  %v1054_v50 = vor.u32 %v1249_v47, %v1051_v48  ;;  %v1115_v52 = vld [vmem:[#allocation2 + $0x1d8] sm:$0xf0]  ;;  %v1247_v59 = vld [vmem:[#allocation2 + $0x144] sm:$0xf]  ;;  %v1043_v60 = vld [vmem:[#allocation2 + $0x148] sm:$0xf0] }
  0x30   :  { %623 = vmatpush.bf16.msrb.mxu1 %v1006_v51  ;;  %v1265_v51 = vld [vmem:[#allocation2 + $0x1d4] sm:$0xf]  ;;  %v1046_v62 = vor.u32 %v1247_v59, %v1043_v60  ;;  %v1107_v0 = vld [vmem:[#allocation2 + $0x1c8] sm:$0xf0]  ;;  %v1099_v6 = vld [vmem:[#allocation2 + $0x1b8] sm:$0xf0] }
  0x31   :  { %590 = vmatpush.bf16.msra.mxu2 %v1018_v3  ;;  %v1118_v53 = vor.u32 %v1265_v51, %v1115_v52  ;;  %v1245_v2 = vld [vmem:[#allocation2 + $0x134] sm:$0xf]  ;;  %v1035_v3 = vld [vmem:[#allocation2 + $0x138] sm:$0xf0]  ;;  %v1027_v9 = vld [vmem:[#allocation2 + $0x128] sm:$0xf0] }
  0x32   :  { %603 = vmatpush.bf16.msra.mxu3 %v1082_v7  ;;  %v1261_v4 = vld [vmem:[#allocation2 + $0x1b4] sm:$0xf]  ;;  %v1038_v5 = vor.u32 %v1245_v2, %v1035_v3  ;;  %v1259_v10 = vld [vmem:[#allocation2 + $0x1a4] sm:$0xf]  ;;  %v1091_v12 = vld [vmem:[#allocation2 + $0x1a8] sm:$0xf0] }
  0x33   :  { %611 = vmatpush.bf16.msrb.mxu0 %v934_v56  ;;  %v1223_v56 = vld [vmem:[#allocation2 + $0x84] sm:$0xf]  ;;  %v1102_v7 = vor.u32 %v1261_v4, %v1099_v6  ;;  %v1094_v14 = vor.u32 %v1259_v10, %v1091_v12  ;;  %v1019_v16 = vld [vmem:[#allocation2 + $0x118] sm:$0xf0]  ;;  %v1257_v17 = vld [vmem:[#allocation2 + $0x194] sm:$0xf] }
  0x34   :  { %624 = vmatpush.bf16.msrb.mxu1 %v998_v57  ;;  %v886_v57 = vor.u32 %v1207_v54, %v883_v55  ;;  %v1083_v18 = vld [vmem:[#allocation2 + $0x198] sm:$0xf0]  ;;  %v1011_v26 = vld [vmem:[#allocation2 + $0x108] sm:$0xf0]  ;;  %v1277_v52 = vld [vmem:[%s1517_s5 + $0x30] sm:$0xff]  ;;  %s1347_s23 = smov [#allocation5]  }
  0x35   :  { %591 = vmatpush.bf16.msra.mxu2 %v1010_v15  ;;  %v1241_v15 = vld [vmem:[#allocation2 + $0x114] sm:$0xf]  ;;  %v1086_v22 = vor.u32 %v1257_v17, %v1083_v18  ;;  %v1278_v51 = vld [vmem:[%s1517_s5 + $0x38] sm:$0xff]  ;;  %v1275_v54 = vld [vmem:[%s1517_s5 + $0x20] sm:$0xff]  ;;  %s831_s24 = sshll.u32 %s1347_s23, 4  ;;  %s833_s27 = sshll.u32 %s1519_s7, 4  ;;  %s832_s24 = int_to_ptr.vmem [resolvable:$true] %s831_s24  ;;  %s834_s27 = int_to_ptr.hbm [resolvable:$true] %s833_s27 }
  0x36   :  { %604 = vmatpush.bf16.msra.mxu3 %v1074_v19  ;;  %v1022_v21 = vor.u32 %v1241_v15, %v1019_v16  ;;  %v1274_v55 = vld [vmem:[%s1517_s5 + $0x18] sm:$0xff]  ;;  %v1272_v59 = vld [vmem:[%s1517_s5 + $0x8] sm:$0xff]  ;;  %v1281_v2 = vld [vmem:[%s1517_s5 + $0x50] sm:$0xff]  ;;  %vm824_vm1 = vcmask 130048  }
  0x37   :  { %612 = vmatpush.bf16.msrb.mxu0 %v926_v61  ;;  %v950_v61 = vor.u32 %v1223_v56, %v947_v58  ;;  %v1286_v56 = vld [vmem:[%s1517_s5 + $0x78] sm:$0xff]  ;;  %v1285_v58 = vld [vmem:[%s1517_s5 + $0x70] sm:$0xff]  ;;  %v1284_v60 = vld [vmem:[%s1517_s5 + $0x68] sm:$0xff] }
  0x38   :  { %625 = vmatpush.bf16.msrb.mxu1 %v990_v63  ;;  %v1263_v63 = vld [vmem:[#allocation2 + $0x1c4] sm:$0xf]  ;;  %v1280_v3 = vld [vmem:[%s1517_s5 + $0x48] sm:$0xff]  ;;  %v232_v6 = vld [vmem:[%s1516_s4] sm:$0x3] }
  0x39   :  { %636 = vmatpush.bf16.msrb.mxu2 %v1070_v29  ;;  %v1110_v1 = vor.u32 %v1263_v63, %v1107_v0  ;;  %v1255_v29 = vld [vmem:[#allocation2 + $0x184] sm:$0xf]  ;;  %v1282_v63 = vld [vmem:[%s1517_s5 + $0x58] sm:$0xff] }
  0x3a   :  { %649 = vmatpush.bf16.msrb.mxu3 %v1134_v30  ;;  %v1075_v30 = vld [vmem:[#allocation2 + $0x188] sm:$0xf0] }
  0x3b   :  { %613 = vmatpush.bf16.msrb.mxu0 %v918_v8  ;;  %v1243_v8 = vld [vmem:[#allocation2 + $0x124] sm:$0xf]  ;;  %v1078_v35 = vor.u32 %v1255_v29, %v1075_v30 }
  0x3c   :  { %626 = vmatpush.bf16.msrb.mxu1 %v982_v11  ;;  %v54_v11 = vld [vmem:[%s1514_s2] sm:$0xf]  ;;  %v1030_v13 = vor.u32 %v1243_v8, %v1027_v9  ;;  %v234_v8 = vperm.slane %v232_v6, 0 }
  0x3d   :  { %637 = vmatpush.bf16.msrb.mxu2 %v1062_v39  ;;  %v56_v19 = vperm.slane %v54_v11, 0  ;;  %v58_v40 = vperm.slane %v54_v11, 2  ;;  %v59_v41 = vperm.slane %v54_v11, 3 }
  0x3e   :  { %650 = vmatpush.bf16.msrb.mxu3 %v1126_v42 }
  0x3f   :  { %614 = vmatpush.bf16.msrb.mxu0 %v910_v20  ;;  %v57_v20 = vperm.slane %v54_v11, 1 }
  0x40   :  { %627 = vmatpush.bf16.msrb.mxu1 %v974_v25  ;;  %v1239_v25 = vld [vmem:[#allocation2 + $0x104] sm:$0xf] }
  0x41   :  { %638 = vmatpush.bf16.msrb.mxu2 %v1054_v50  ;;  %v1014_v33 = vor.u32 %v1239_v25, %v1011_v26 }
  0x42   :  { %651 = vmatpush.bf16.msrb.mxu3 %v1118_v53  ;;  %v1276_v53 = vld [vmem:[%s1517_s5 + $0x28] sm:$0xff] }
  0x43   :  { %615 = vmatpush.bf16.msrb.mxu0 %v902_v34 }
  0x44   :  { %628 = vmatpush.bf16.msrb.mxu1 %v966_v38 }
  0x45   :  { %639 = vmatpush.bf16.msrb.mxu2 %v1046_v62  ;;  %v1283_v62 = vld [vmem:[%s1517_s5 + $0x60] sm:$0xff] }
  0x46   :  { %652 = vmatpush.bf16.msrb.mxu3 %v1110_v1 }
  0x47   :  { %616 = vmatpush.bf16.msrb.mxu0 %v894_v45 }
  0x48   :  { %629 = vmatpush.bf16.msrb.mxu1 %v958_v49 }
  0x49   :  { %640 = vmatpush.bf16.msrb.mxu2 %v1038_v5 }
  0x4a   :  { %653 = vmatpush.bf16.msrb.mxu3 %v1102_v7  ;;  %v1279_v7 = vld [vmem:[%s1517_s5 + $0x40] sm:$0xff] }
  0x4b   :  { %617 = vmatpush.bf16.msrb.mxu0 %v886_v57  ;;  %v1273_v57 = vld [vmem:[%s1517_s5 + $0x10] sm:$0xff] }
  0x4c   :  { %630 = vmatpush.bf16.msrb.mxu1 %v950_v61  ;;  %v1271_v61 = vld [vmem:[%s1517_s5] sm:$0xff] }
  0x4d   :  { %641 = vmatpush.bf16.msrb.mxu2 %v1030_v13 }
  0x4e   :  { %654 = vmatpush.bf16.msrb.mxu3 %v1094_v14 }
  0x51   :  { %642 = vmatpush.bf16.msrb.mxu2 %v1022_v21 }
  0x52   :  { %655 = vmatpush.bf16.msrb.mxu3 %v1086_v22 }
  0x55   :  { %643 = vmatpush.bf16.msrb.mxu2 %v1014_v33 }
  0x56   :  { %656 = vmatpush.bf16.msrb.mxu3 %v1078_v35 }
  0x93   :  { %v117_v23 = vpop.f32.mrf.mxu2 }
  0x94   :  { %v118_v27 = vadd.f32 %v117_v23, %v56_v19  ;;  %v130_v28 = vpop.f32.mrf.mxu3 }
  0x95   :  { %v131_v31 = vadd.f32 %v130_v28, %v57_v20  ;;  %v235_v20 = vperm.slane %v232_v6, 1 }
  0x96   :  { %v160_v32 = vmax.f32 %v118_v27, 0.0 }
  0x97   :  { %v161_v34 = vmax.f32 %v131_v31, 0.0 }
  0x98   :  { %v164_v36 = vpack.c.bf16 %v160_v32, %v160_v32 }
  0x99   :  { %v165_v37 = vpack.c.bf16 %v161_v34, %v161_v34 }
  0x9a   :  { %566 = vmatmul.bf16.vlgmr.msra.gmra.mxu0 %v164_v36 }
  0x9b   :  { %579 = vmatmul.bf16.vlgmr.msra.gmra.mxu1 %v165_v37  ;;  %v119_v38 = vpop.f32.mrf.mxu2  ;;  %798 = vmatpush.bf16.msra.mxu0 %v1278_v51 }
  0x9c   :  { %v132_v39 = vpop.f32.mrf.mxu3  ;;  %811 = vmatpush.bf16.msra.mxu1 %v1286_v56 }
  0x9f   :  { %799 = vmatpush.bf16.msra.mxu0 %v1277_v52 }
  0xa0   :  { %812 = vmatpush.bf16.msra.mxu1 %v1285_v58 }
  0xa3   :  { %v143_v42 = vpop.f32.mrf.mxu2  ;;  %800 = vmatpush.bf16.msra.mxu0 %v1276_v53 }
  0xa4   :  { %v144_v43 = vadd.f32 %v143_v42, %v58_v40  ;;  %v156_v24 = vpop.f32.mrf.mxu3  ;;  %813 = vmatpush.bf16.msra.mxu1 %v1284_v60 }
  0xa5   :  { %v157_v44 = vadd.f32 %v156_v24, %v59_v41 }
  0xa6   :  { %v162_v45 = vmax.f32 %v144_v43, 0.0 }
  0xa7   :  { %v163_v46 = vmax.f32 %v157_v44, 0.0  ;;  %801 = vmatpush.bf16.msra.mxu0 %v1275_v54 }
  0xa8   :  { %v166_v47 = vpack.c.bf16 %v162_v45, %v162_v45  ;;  %814 = vmatpush.bf16.msra.mxu1 %v1283_v62 }
  0xa9   :  { %v167_v48 = vpack.c.bf16 %v163_v46, %v163_v46 }
  0xaa   :  { %592 = vmatmul.bf16.vlgmr.msra.gmra.mxu2 %v166_v47  ;;  %618 = vmatmul.bf16.vlgmr.msrb.gmra.mxu0 %v164_v36 }
  0xab   :  { %605 = vmatmul.bf16.vlgmr.msra.gmra.mxu3 %v167_v48  ;;  %631 = vmatmul.bf16.vlgmr.msrb.gmra.mxu1 %v165_v37  ;;  %v145_v49 = vpop.f32.mrf.mxu2  ;;  %v1291_v37 = vld [vmem:[%s1518_s6] ss:$0 sm:$0xff] }
  0xac   :  { %v158_v50 = vpop.f32.mrf.mxu3  ;;  %802 = vmatpush.bf16.msra.mxu0 %v1274_v55  ;;  %815 = vmatpush.bf16.msra.mxu1 %v1282_v63 }
  0xb0   :  { %803 = vmatpush.bf16.msra.mxu0 %v1273_v57  ;;  %816 = vmatpush.bf16.msra.mxu1 %v1281_v2 }
  0xb4   :  { %804 = vmatpush.bf16.msra.mxu0 %v1272_v59  ;;  %817 = vmatpush.bf16.msra.mxu1 %v1280_v3 }
  0xb8   :  { %805 = vmatpush.bf16.msra.mxu0 %v1271_v61  ;;  %818 = vmatpush.bf16.msra.mxu1 %v1279_v7 }
  0xba   :  { %644 = vmatmul.bf16.vlgmr.msrb.gmra.mxu2 %v166_v47 }
  0xbb   :  { %657 = vmatmul.bf16.vlgmr.msrb.gmra.mxu3 %v167_v48 }
 0x117   :  { %v567_v0 = vpop.f32.mrf.mxu0 }
 0x118   :  { %v580_v1 = vpop.f32.mrf.mxu1  ;;  %v568_v10 = vadd.f32 %v567_v0, %v234_v8 }
 0x11a   :  { %v581_v12 = vadd.f32 %v580_v1, %v568_v10 }
 0x11f   :  { %v569_v4 = vpop.f32.mrf.mxu0 }
 0x120   :  { %v582_v5 = vpop.f32.mrf.mxu1 }
 0x127   :  { %v619_v9 = vpop.f32.mrf.mxu0 }
 0x128   :  { %v632_v11 = vpop.f32.mrf.mxu1  ;;  %v620_v25 = vadd.f32 %v619_v9, %v235_v20 }
 0x12a   :  { %v633_v26 = vadd.f32 %v632_v11, %v620_v25 }
 0x12d   :  { %v593_v13 = vpop.f32.mrf.mxu2 }
 0x12e   :  { %v594_v14 = vadd.f32 %v593_v13, %v581_v12  ;;  %v606_v15 = vpop.f32.mrf.mxu3 }
 0x12f   :  { %v621_v16 = vpop.f32.mrf.mxu0 }
 0x130   :  { %v607_v17 = vadd.f32 %v606_v15, %v594_v14  ;;  %v634_v18 = vpop.f32.mrf.mxu1 }
 0x132   :  { %v662_v19 = vmax.f32 %v607_v17, 0.0 }
 0x134   :  { %v664_v21 = vpack.c.bf16 %v662_v19, %v662_v19 }
 0x135   :  { %v595_v22 = vpop.f32.mrf.mxu2 }
 0x136   :  { %v608_v23 = vpop.f32.mrf.mxu3  ;;  %806 = vmatmul.bf16.vlgmr.msra.gmra.mxu0 %v664_v21 }
 0x13d   :  { %v645_v27 = vpop.f32.mrf.mxu2 }
 0x13e   :  { %v646_v28 = vadd.f32 %v645_v27, %v633_v26  ;;  %v658_v29 = vpop.f32.mrf.mxu3 }
 0x140   :  { %v659_v30 = vadd.f32 %v658_v29, %v646_v28 }
 0x142   :  { %v663_v31 = vmax.f32 %v659_v30, 0.0 }
 0x144   :  { %v665_v32 = vpack.c.bf16 %v663_v31, %v663_v31 }
 0x145   :  { %v647_v33 = vpop.f32.mrf.mxu2 }
 0x146   :  { %v660_v34 = vpop.f32.mrf.mxu3  ;;  %819 = vmatmul.bf16.vlgmr.msra.gmra.mxu1 %v665_v32 }
 0x1b3   :  { %v807_v35 = vpop.f32.mrf.mxu0 }
 0x1b4   :  { %v808_v38 = vadd.f32 %v1291_v37, %v807_v35 }
 0x1bb   :  { %v809_v36 = vpop.f32.mrf.mxu0 }
 0x1c3   :  { %v820_v39 = vpop.f32.mrf.mxu1 }
 0x1c4   :  { %v821_v40 = vadd.f32 %v820_v39, %v808_v38 }
 0x1c6   :  { %825 = vst.msk [vmem:[#allocation5] sm:$0xff] %vm824_vm1, %v821_v40 }
 0x1c7   :  { %836 = dma.vmem_to_hbm [thread:$0]  %s832_s24, 128, %s834_s27, [#allocation4]  }
 0x1cb   :  { %v822_v41 = vpop.f32.mrf.mxu1 }
 0x1cc   :  { %1342 = dma.done.wait [#allocation4], 128  }
 0x1cd   :  { %1343 = vsyncadd [#allocation4], 4294967168 }
 0x1ce   :  { %841 = vsyncpa [#allocation3], 1 }
 0x1cf   :  { %842 = vsyncpa [#allocation4], 1 }

</bundles_post_ra>
